<compile_context>
chip_gen: v7x
topology: tpu7x:2x2x1
jax: 0.10.0
libtpu: 0.0.40
codegen_flags: <defaults>
</compile_context>

<pallas_src>
import jax
import jax.numpy as jnp
from jax import lax
from jax.experimental import pallas as pl
from jax.experimental.pallas import tpu as pltpu


def _causal_bow_kernel(att_ref, x_ref, y_ref):
    # att_ref: (T, T) analytic prefix-mean weights (grid-invariant, VMEM-resident).
    # x_ref / y_ref: (T, tn) lane-dense tiles of the (T, B*C) flattened tensors.
    y = jnp.dot(att_ref[...], x_ref[...], preferred_element_type=jnp.float32)
    y_ref[...] = y.astype(y_ref.dtype)


def causal_bow(x, *, tile_n=512):
    """x: (B, T, C) array. Returns the causal prefix-mean, shape (B, T, C)."""
    B, T, C = x.shape
    N = B * C

    # Analytic weights: softmax of a 0/-inf tril mask is exactly 1/(t+1) over
    # the causal prefix. Computed once here (not per grid step, no EUP/XLU work).
    row = lax.broadcasted_iota(jnp.int32, (T, T), 0)
    col = lax.broadcasted_iota(jnp.int32, (T, T), 1)
    w_dtype = jnp.bfloat16 if x.dtype == jnp.bfloat16 else jnp.float32
    att = jnp.where(col <= row,
                    1.0 / (row.astype(jnp.float32) + 1.0),
                    0.0).astype(w_dtype)

    # Fuse batch into the lane dimension: (B, T, C) -> (T, B*C), padded to a
    # multiple of 128 lanes so output stores are unmasked and MXU-shaped.
    xf = jnp.transpose(x, (1, 0, 2)).reshape(T, N)
    tn = min(tile_n, ((N + 127) // 128) * 128)   # lane-dense tile width
    n_pad = pl.cdiv(N, tn) * tn
    if n_pad != N:
        xf = jnp.pad(xf, ((0, 0), (0, n_pad - N)))

    yf = pl.pallas_call(
        _causal_bow_kernel,
        out_shape=jax.ShapeDtypeStruct((T, n_pad), x.dtype),
        grid_spec=pltpu.PrefetchScalarGridSpec(
            num_scalar_prefetch=0,
            grid=(n_pad // tn,),
            in_specs=[
                # Constant index_map -> weights DMA'd once, resident across grid.
                pl.BlockSpec((T, T), lambda n: (0, 0)),
                pl.BlockSpec((T, tn), lambda n: (0, n)),
            ],
            out_specs=pl.BlockSpec((T, tn), lambda n: (0, n)),
        ),
        compiler_params=pltpu.CompilerParams(
            dimension_semantics=("parallel",)),
    )(att, xf)

    if n_pad != N:
        yf = yf[:, :N]
    return jnp.transpose(yf.reshape(T, B, C), (1, 0, 2))


def causal_bow_ref(x):
    """Pure-JAX reference mirroring the PyTorch module exactly."""
    B, T, C = x.shape
    bias = jnp.tril(jnp.ones((T, T), dtype=jnp.float32))
    att = jnp.where(bias == 0, -jnp.inf, 0.0)
    att = jax.nn.softmax(att, axis=-1)
    return jnp.einsum('tk,bkc->btc', att, x.astype(jnp.float32)).astype(x.dtype)


if __name__ == "__main__":
    # config.block_size corresponds to the max T; use T = block_size = 8 here.
    B, T, C = 2, 8, 32
    key = jax.random.PRNGKey(0)
    x = jax.random.normal(key, (B, T, C), dtype=jnp.float32)

    y = causal_bow(x)
    y = jax.block_until_ready(y)

    y_ref = causal_bow_ref(x)
    assert y.shape == (B, T, C)
    assert jnp.allclose(y, y_ref, atol=1e-5, rtol=1e-5)

    print("KERNEL_OK")
</pallas_src>

<mosaic_0001>
module attributes {stable_mosaic.version = 11 : i64} {
  func.func @_causal_bow_kernel(%arg0: i32, %arg1: memref<8x8xf32, #tpu.memory_space<vmem>>, %arg2: memref<8x128xf32, #tpu.memory_space<vmem>>, %arg3: memref<8x128xf32, #tpu.memory_space<vmem>>) attributes {dimension_semantics = [#tpu.dimension_semantics<parallel>], iteration_bounds = array<i64: 1>, scalar_prefetch = 0 : i64, scratch_operands = 0 : i64, tpu.core_type = #tpu.core_type<tc>, window_params = [{pipeline_mode = #tpu.pipeline_mode<synchronous>, transform_indices = @transform_0, window_bounds = array<i64: 8, 8>}, {transform_indices = @transform_1, window_bounds = array<i64: 8, 128>}, {transform_indices = @transform_2, window_bounds = array<i64: 8, 128>}]} {
    %c0 = arith.constant 0 : index
    %c0_0 = arith.constant 0 : index
    %0 = vector.load %arg1[%c0, %c0_0] : memref<8x8xf32, #tpu.memory_space<vmem>>, vector<8x8xf32>
    %c0_1 = arith.constant 0 : index
    %c0_2 = arith.constant 0 : index
    %1 = vector.load %arg2[%c0_1, %c0_2] : memref<8x128xf32, #tpu.memory_space<vmem>>, vector<8x128xf32>
    %cst = arith.constant dense<0.000000e+00> : vector<8x128xf32>
    %2 = tpu.matmul %0, %1, %cst {dimension_numbers = #tpu.dot_dimension_numbers<[1], [0], [0], [1], [0, 0, 1, 1], [], []>} : vector<8x8xf32>, vector<8x128xf32>, vector<8x128xf32> -> vector<8x128xf32>
    %c0_3 = arith.constant 0 : index
    %c0_4 = arith.constant 0 : index
    %3 = vector.load %arg3[%c0_3, %c0_4] : memref<8x128xf32, #tpu.memory_space<vmem>>, vector<8x128xf32>
    tpu.vector_store %arg3[%c0_3, %c0_4], %2 {strides = array<i32>} : memref<8x128xf32, #tpu.memory_space<vmem>>, vector<8x128xf32>,
    return
  }
  func.func @transform_0(%arg0: i32) -> (i32, i32) {
    %c0_i32 = arith.constant 0 : i32
    %c0_i32_0 = arith.constant 0 : i32
    %c0_i32_1 = arith.constant 0 : i32
    return %c0_i32, %c0_i32_0 : i32, i32
  }
  func.func @transform_1(%arg0: i32) -> (i32, i32) {
    %c0_i32 = arith.constant 0 : i32
    %c0_i32_0 = arith.constant 0 : i32
    return %c0_i32, %arg0 : i32, i32
  }
  func.func @transform_2(%arg0: i32) -> (i32, i32) {
    %c0_i32 = arith.constant 0 : i32
    %c0_i32_0 = arith.constant 0 : i32
    return %c0_i32, %arg0 : i32, i32
  }
}

</mosaic_0001>

<bundles_post_ra>
// kernel: tpu_custom_call.1
= control target key start
LH: loop header
LB: loop body
LE: loop exit
PB: predicated region body
PF: predicated region fallthrough
CT: control target
= control target key end

     0   :  { %7 = vsyncpa [#allocation3], 0  ;;  %s270_s0 = inlined_call_operand.hbm [shape: f32[8,8], index: 0, kind: input, shape index: {}]   ;;  %s271_s1 = inlined_call_operand.hbm [shape: f32[8,128], index: 1, kind: input, shape index: {}]   ;;  %s272_s2 = inlined_call_operand.hbm [shape: f32[8,128], index: 2, kind: output, shape index: {}]  }
   0x1   :  { %8 = vsyncpa [#allocation6], 0 }
   0x2   :  { %9 = vsyncpa [#allocation4], 0  ;;  %s214_s9 = smov [#allocation2]   ;;  %s215_s11 = smov [#allocation5]  }
   0x3   :  { %s16_s10 = sshll.u32 %s214_s9, 4  ;;  %s26_s12 = sshll.u32 %s215_s11, 4  ;;  %s17_s10 = int_to_ptr.vmem [resolvable:$true] %s16_s10  ;;  %s27_s12 = int_to_ptr.vmem [resolvable:$true] %s26_s12 }
   0x4   :  { %s142_s15 = scalar_lea.hbm %s270_s0, 128 }
   0x5   :  { %p143_p0 = scmp.ne.s32.totalorder %s270_s0, %s142_s15  ;;  %p146_p1 = scmp.lt.u32.totalorder %s142_s15, %s270_s0 }
   0x7   :  { %p148_p2 = pnand %p146_p1, %p143_p0 }
   0x9   :  { %151 = shalt.err (!%p148_p2)
}
   0xa   :  { %s152_s20 = scalar_lea.vmem %s17_s10, 128  ;;  %p157_p4 = scmp.lt.s32.totalorder %s17_s10, %s17_s10 }
   0xb   :  { %p153_p3 = scmp.ne.s32.totalorder %s17_s10, %s152_s20  ;;  %p158_p5 = scmp.lt.s32.totalorder %s152_s20, %s152_s20 }
   0xd   :  { %p159_p6 = por %p158_p5, %p157_p4 }
   0xf   :  { %p160_p7 = pnand %p159_p6, %p153_p3 }
  0x11   :  { %163 = shalt.err (!%p160_p7)
}
  0x12   :  { %19 = dma.hbm_to_vmem [thread:$0]  %s270_s0, 128, %s17_s10, [#allocation3]  }
  0x13   :  { %s164_s25 = scalar_lea.hbm %s271_s1, 128 }
  0x14   :  { %p165_p8 = scmp.ne.s32.totalorder %s271_s1, %s164_s25  ;;  %p168_p9 = scmp.lt.u32.totalorder %s164_s25, %s271_s1 }
  0x16   :  { %p170_p10 = pnand %p168_p9, %p165_p8 }
  0x18   :  { %173 = shalt.err (!%p170_p10)
}
  0x19   :  { %s174_s30 = scalar_lea.vmem %s27_s12, 128  ;;  %p179_p12 = scmp.lt.s32.totalorder %s27_s12, %s27_s12 }
  0x1a   :  { %p175_p11 = scmp.ne.s32.totalorder %s27_s12, %s174_s30  ;;  %p180_p13 = scmp.lt.s32.totalorder %s174_s30, %s174_s30 }
  0x1c   :  { %p181_p0 = por %p180_p13, %p179_p12 }
  0x1e   :  { %p182_p1 = pnand %p181_p0, %p175_p11 }
  0x20   :  { %185 = shalt.err (!%p182_p1)
}
  0x21   :  { %29 = dma.hbm_to_vmem [thread:$0]  %s271_s1, 128, %s27_s12, [#allocation6]  }
  0x22   :  { %208 = dma.done.wait [#allocation3], 128  }
  0x23   :  { %209 = vsyncadd [#allocation3], 4294967168 }
  0x24   :  { %210 = dma.done.wait [#allocation6], 128  }
  0x25   :  { %211 = vsyncadd [#allocation6], 4294967168  ;;  %v216_v0 = vmov 0.0   ;;  %vm217_vm0 = vmmov 0   ;;  %vm38_vm1 = vcmask 64512   ;;  %v37_v1 = vld [vmem:[#allocation5] sm:$0xff] }
  0x26   :  { %132 = vmatprep.subr.mxu0 %v216_v0  ;;  %134 = vmatprep.mubr.msk.f32.mxu0 %vm217_vm0, %v216_v0  ;;  %v36_v2 = vld [vmem:[#allocation2] sm:$0xff]  ;;  %s218_s4 = smov [#allocation7]  }
  0x27   :  { %133 = vmatpush3.msra.mxu0 %v37_v1  ;;  %s119_s5 = sshll.u32 %s218_s4, 4  ;;  %s120_s5 = int_to_ptr.vmem [resolvable:$true] %s119_s5 }
  0x28   :  { %135 = vmatmul.mubr.msk.f32.vlgmr.msra.gmra.mrb[0].mxu0 %vm38_vm1, %v36_v2  ;;  %s186_s1 = scalar_lea.vmem %s120_s5, 128  ;;  %p191_p3 = scmp.lt.s32.totalorder %s120_s5, %s120_s5 }
  0x29   :  { %p187_p2 = scmp.ne.s32.totalorder %s120_s5, %s186_s1  ;;  %p192_p4 = scmp.lt.s32.totalorder %s186_s1, %s186_s1 }
  0x2b   :  { %p193_p5 = por %p192_p4, %p191_p3 }
  0x2d   :  { %p194_p6 = pnand %p193_p5, %p187_p2 }
  0xfb   :  { %v108_v3 = vpop.f32.mrb[0].mxu0 }
  0xfc   :  { %112 = vst [vmem:[#allocation7] sm:$0xff] %v108_v3  ;;  %v136_v4 = vpop.f32.mrb[1].mxu0 }
  0xfd   :  { %197 = shalt.err (!%p194_p6)
}
  0xfe   :  { %s198_s8 = scalar_lea.hbm %s272_s2, 128 }
  0xff   :  { %p199_p7 = scmp.ne.s32.totalorder %s272_s2, %s198_s8  ;;  %p202_p8 = scmp.lt.u32.totalorder %s198_s8, %s272_s2 }
 0x101   :  { %p204_p9 = pnand %p202_p8, %p199_p7 }
 0x103   :  { %207 = shalt.err (!%p204_p9)
}
 0x104   :  { %122 = dma.vmem_to_hbm [thread:$0]  %s120_s5, 128, %s272_s2, [#allocation4]  }
 0x105   :  { %212 = dma.done.wait [#allocation4], 128  }
 0x106   :  { %213 = vsyncadd [#allocation4], 4294967168 }
 0x107   :  { %126 = vsyncpa [#allocation3], 1 }
 0x108   :  { %127 = vsyncpa [#allocation6], 1 }
 0x109   :  { %128 = vsyncpa [#allocation4], 1 }

</bundles_post_ra>
